<compile_context>
chip_gen: v7x
topology: tpu7x:2x2x1
jax: 0.10.0
libtpu: 0.0.40
codegen_flags: <defaults>
</compile_context>

<pallas_src>
import jax
import jax.numpy as jnp
from jax.experimental import pallas as pl
from jax.experimental.pallas import tpu as pltpu


# ---------------------------------------------------------------------------
# Kernel 1: gate = sigmoid(relu(se @ W1^T + b1) @ W2^T + b2)   (tiny, one shot)
# ---------------------------------------------------------------------------
def gate_kernel(se_ref, w1t_ref, b1_ref, w2t_ref, b2_ref, g_ref):
    # se_ref : (B, C)   squeeze input
    # w1t/w2t: (C, C)   1x1-conv weights, pre-transposed to (C_in, C_out)
    # b1/b2  : (1, C)
    # g_ref  : (B, C)   gate, already cast to the feature-map dtype
    se = se_ref[...].astype(jnp.float32)
    h = jnp.dot(se, w1t_ref[...], preferred_element_type=jnp.float32) + b1_ref[...]
    h = jnp.maximum(h, 0.0)
    g = jnp.dot(h, w2t_ref[...], preferred_element_type=jnp.float32) + b2_ref[...]
    g_ref[...] = jax.nn.sigmoid(g).astype(g_ref.dtype)


# ---------------------------------------------------------------------------
# Kernel 2: out = x * gate   (pure HBM-bandwidth-bound channel scale, streamed)
# ---------------------------------------------------------------------------
def scale_kernel(x_ref, gate_ref, o_ref):
    # x_ref: (C, t_hw); gate_ref: (C, 1) broadcasts across the lane (spatial) dim.
    o_ref[...] = x_ref[...] * gate_ref[...]


def _spatial_tile(hw, c, itemsize, target_bytes=4 << 20):
    """Largest lane-dense spatial chunk (multiple of 128) whose (C, t_hw) slab
    stays under `target_bytes`.  Caller uses cdiv, so HW need not divide evenly."""
    cap = (target_bytes // (c * itemsize)) // 128 * 128
    cap = max(cap, 128)
    if hw <= cap:
        return hw          # full-extent block (always a legal BlockSpec dim)
    return cap             # multiple of 128 -> lane-dense, unmasked stores


def se_layer_pallas(x, x_se, w1, b1, w2, b2):
    """x: (B, C, H, W); x_se: (B, C, 1, 1); w1/w2: (C, C) [or (C, C, 1, 1)];
    b1/b2: (C,).  Returns x * sigmoid(W2 @ relu(W1 @ x_se + b1) + b2)."""
    B, C, H, W = x.shape
    HW = H * W

    if w1.ndim == 4:
        w1 = w1.reshape(C, C)
    if w2.ndim == 4:
        w2 = w2.reshape(C, C)

    se2 = x_se.reshape(B, C)
    w1t = w1.T                      # (C_in, C_out) so the gate kernel does se @ w1t
    w2t = w2.T
    b1r = b1.reshape(1, C)
    b2r = b2.reshape(1, C)

    # --- Stage 1: compute the (B, C) gate once (whole arrays resident in VMEM).
    gate = pl.pallas_call(
        gate_kernel,
        out_shape=jax.ShapeDtypeStruct((B, C), x.dtype),
    )(se2, w1t, b1r, w2t, b2r)
    gate3 = gate.reshape(B, C, 1)   # column per batch; broadcasts over lanes

    # --- Stage 2: stream x through the channel-wise rescale.
    x2 = x.reshape(B, C, HW)
    t_hw = _spatial_tile(HW, C, x.dtype.itemsize)
    n_hw = pl.cdiv(HW, t_hw)

    # Megacore guard (v7x has 2 TCs): make sure there are >= 2 grid steps.
    if B * n_hw < 2 and HW > 128:
        t_hw = min(HW, max(128, ((pl.cdiv(HW, 2) + 127) // 128) * 128))
        n_hw = pl.cdiv(HW, t_hw)

    cost = pl.CostEstimate(
        flops=B * C * HW,
        transcendentals=0,
        bytes_accessed=(2 * B * C * HW + B * C) * x.dtype.itemsize,
    )

    out = pl.pallas_call(
        scale_kernel,
        out_shape=jax.ShapeDtypeStruct((B, C, HW), x.dtype),
        grid=(B, n_hw),
        in_specs=[
            pl.BlockSpec((pl.Squeezed(), C, t_hw), lambda b, j: (b, 0, j)),  # x slab
            pl.BlockSpec((pl.Squeezed(), C, 1), lambda b, j: (b, 0, 0)),     # gate col
        ],
        out_specs=pl.BlockSpec((pl.Squeezed(), C, t_hw), lambda b, j: (b, 0, j)),
        compiler_params=pltpu.CompilerParams(
            dimension_semantics=("parallel", "parallel")),
        cost_estimate=cost,
    )(x2, gate3)

    return out.reshape(B, C, H, W)


if __name__ == "__main__":
    # Small shapes consistent with the module: B=2, C=32 channels, 16x16 spatial.
    B, C, H, W = 2, 32, 16, 16

    key = jax.random.PRNGKey(0)
    kx, ks, kw1, kb1, kw2, kb2 = jax.random.split(key, 6)

    x = jax.random.normal(kx, (B, C, H, W), dtype=jnp.float32)
    x_se = jax.random.normal(ks, (B, C, 1, 1), dtype=jnp.float32)
    w1 = jax.random.normal(kw1, (C, C), dtype=jnp.float32) * 0.1   # conv_reduce (C_out, C_in)
    b1 = jax.random.normal(kb1, (C,), dtype=jnp.float32) * 0.1
    w2 = jax.random.normal(kw2, (C, C), dtype=jnp.float32) * 0.1   # conv_expand (C_out, C_in)
    b2 = jax.random.normal(kb2, (C,), dtype=jnp.float32) * 0.1

    out = jax.block_until_ready(se_layer_pallas(x, x_se, w1, b1, w2, b2))

    # Pure-JAX reference (== PyTorch SELayer.forward with 1x1 convs as linears).
    se_vec = x_se.reshape(B, C)
    h = jnp.maximum(se_vec @ w1.T + b1, 0.0)
    gate_ref = jax.nn.sigmoid(h @ w2.T + b2)
    ref = x * gate_ref[:, :, None, None]
    assert jnp.allclose(out, ref, atol=1e-5, rtol=1e-5), "f32 mismatch vs reference"

    # bf16 feature-map path: gate math stays in f32; multiply is bf16-native.
    xb = x.astype(jnp.bfloat16)
    outb = jax.block_until_ready(se_layer_pallas(xb, x_se, w1, b1, w2, b2))
    refb = (xb.astype(jnp.float32) * gate_ref[:, :, None, None]).astype(jnp.bfloat16)
    assert jnp.allclose(outb.astype(jnp.float32), refb.astype(jnp.float32),
                        atol=2e-2, rtol=2e-2), "bf16 mismatch vs reference"

    print("KERNEL_OK")
</pallas_src>

<mosaic_0001>
module attributes {stable_mosaic.version = 11 : i64} {
  func.func @gate_kernel(%arg0: memref<2x32xf32, #tpu.memory_space<vmem>>, %arg1: memref<32x32xf32, #tpu.memory_space<vmem>>, %arg2: memref<1x32xf32, #tpu.memory_space<vmem>>, %arg3: memref<32x32xf32, #tpu.memory_space<vmem>>, %arg4: memref<1x32xf32, #tpu.memory_space<vmem>>, %arg5: memref<2x32xf32, #tpu.memory_space<vmem>>) attributes {dimension_semantics = [], scalar_prefetch = 0 : i64, scratch_operands = 0 : i64, tpu.core_type = #tpu.core_type<tc>} {
    %c0 = arith.constant 0 : index
    %c0_0 = arith.constant 0 : index
    %0 = vector.load %arg0[%c0, %c0_0] : memref<2x32xf32, #tpu.memory_space<vmem>>, vector<2x32xf32>
    %c0_1 = arith.constant 0 : index
    %c0_2 = arith.constant 0 : index
    %1 = vector.load %arg1[%c0_1, %c0_2] : memref<32x32xf32, #tpu.memory_space<vmem>>, vector<32x32xf32>
    %cst = arith.constant dense<0.000000e+00> : vector<2x32xf32>
    %2 = tpu.matmul %0, %1, %cst {dimension_numbers = #tpu.dot_dimension_numbers<[1], [0], [0], [1], [0, 0, 1, 1], [], []>} : vector<2x32xf32>, vector<32x32xf32>, vector<2x32xf32> -> vector<2x32xf32>
    %c0_3 = arith.constant 0 : index
    %c0_4 = arith.constant 0 : index
    %3 = vector.load %arg2[%c0_3, %c0_4] : memref<1x32xf32, #tpu.memory_space<vmem>>, vector<1x32xf32>
    %4 = vector.broadcast %3 : vector<1x32xf32> to vector<2x32xf32>
    %5 = arith.addf %2, %4 : vector<2x32xf32>
    %cst_5 = arith.constant 0.000000e+00 : f32
    %6 = vector.broadcast %cst_5 : f32 to vector<2x32xf32>
    %7 = arith.maximumf %5, %6 : vector<2x32xf32>
    %c0_6 = arith.constant 0 : index
    %c0_7 = arith.constant 0 : index
    %8 = vector.load %arg3[%c0_6, %c0_7] : memref<32x32xf32, #tpu.memory_space<vmem>>, vector<32x32xf32>
    %cst_8 = arith.constant dense<0.000000e+00> : vector<2x32xf32>
    %9 = tpu.matmul %7, %8, %cst_8 {dimension_numbers = #tpu.dot_dimension_numbers<[1], [0], [0], [1], [0, 0, 1, 1], [], []>} : vector<2x32xf32>, vector<32x32xf32>, vector<2x32xf32> -> vector<2x32xf32>
    %c0_9 = arith.constant 0 : index
    %c0_10 = arith.constant 0 : index
    %10 = vector.load %arg4[%c0_9, %c0_10] : memref<1x32xf32, #tpu.memory_space<vmem>>, vector<1x32xf32>
    %11 = vector.broadcast %10 : vector<1x32xf32> to vector<2x32xf32>
    %12 = arith.addf %9, %11 : vector<2x32xf32>
    %13 = arith.negf %12 : vector<2x32xf32>
    %14 = math.exp %13 : vector<2x32xf32>
    %cst_11 = arith.constant 1.000000e+00 : f32
    %15 = vector.broadcast %cst_11 : f32 to vector<2x32xf32>
    %16 = arith.addf %15, %14 : vector<2x32xf32>
    %17 = arith.divf %15, %16 : vector<2x32xf32>
    %c0_12 = arith.constant 0 : index
    %c0_13 = arith.constant 0 : index
    %18 = vector.load %arg5[%c0_12, %c0_13] : memref<2x32xf32, #tpu.memory_space<vmem>>, vector<2x32xf32>
    tpu.vector_store %arg5[%c0_12, %c0_13], %17 {strides = array<i32>} : memref<2x32xf32, #tpu.memory_space<vmem>>, vector<2x32xf32>,
    return
  }
}

</mosaic_0001>

<bundles_post_ra>
// kernel: tpu_custom_call.1
= control target key start
LH: loop header
LB: loop body
LE: loop exit
PB: predicated region body
PF: predicated region fallthrough
CT: control target
= control target key end

     0   :  { %10 = vsyncpa [#allocation3], 0  ;;  %s510_s0 = inlined_call_operand.hbm [shape: f32[2,32], index: 0, kind: input, shape index: {}]   ;;  %s511_s1 = inlined_call_operand.hbm [shape: f32[32,32], index: 1, kind: input, shape index: {}]   ;;  %s512_s2 = inlined_call_operand.vmem [shape: f32[1,32], index: 2, kind: input, shape index: {}]   ;;  %s513_s3 = inlined_call_operand.hbm [shape: f32[32,32], index: 3, kind: input, shape index: {}]   ;;  %s514_s4 = inlined_call_operand.vmem [shape: f32[1,32], index: 4, kind: input, shape index: {}]   ;;  %s515_s5 = inlined_call_operand.hbm [shape: f32[2,32], index: 5, kind: output, shape index: {}]  }
   0x1   :  { %11 = vsyncpa [#allocation6], 0 }
   0x2   :  { %12 = vsyncpa [#allocation4], 0  ;;  %s411_s18 = smov [#allocation5]   ;;  %s317_s22 = scalar_lea.hbm %s511_s1, 512 }
   0x3   :  { %s28_s19 = sshll.u32 %s411_s18, 4  ;;  %p318_p0 = scmp.ne.s32.totalorder %s511_s1, %s317_s22  ;;  %s29_s19 = int_to_ptr.vmem [resolvable:$true] %s28_s19 }
   0x4   :  { %p321_p1 = scmp.lt.u32.totalorder %s317_s22, %s511_s1 }
   0x6   :  { %p323_p2 = pnand %p321_p1, %p318_p0 }
   0x8   :  { %326 = shalt.err (!%p323_p2)
}
   0x9   :  { %s327_s27 = scalar_lea.vmem %s29_s19, 512  ;;  %p332_p4 = scmp.lt.s32.totalorder %s29_s19, %s29_s19 }
   0xa   :  { %p328_p3 = scmp.ne.s32.totalorder %s29_s19, %s327_s27  ;;  %p333_p5 = scmp.lt.s32.totalorder %s327_s27, %s327_s27 }
   0xc   :  { %p334_p6 = por %p333_p5, %p332_p4 }
   0xe   :  { %p335_p7 = pnand %p334_p6, %p328_p3 }
  0x10   :  { %338 = shalt.err (!%p335_p7)
}
  0x11   :  { %s412_s28 = smov 128   ;;  %s413_s29 = smov 8  }
  0x12   :  { %34 = dma.hbm_to_vmem [thread:$0]  %s511_s1, 512, %s29_s19, [#allocation6], %s412_s28, %s412_s28, %s413_s29  }
  0x13   :  { %s414_s7 = smov [#allocation2]   ;;  %s415_s9 = smov [#allocation7]  }
  0x14   :  { %s19_s8 = sshll.u32 %s414_s7, 4  ;;  %s42_s10 = sshll.u32 %s415_s9, 4  ;;  %s20_s8 = int_to_ptr.vmem [resolvable:$true] %s19_s8  ;;  %s43_s10 = int_to_ptr.vmem [resolvable:$true] %s42_s10 }
  0x15   :  { %s339_s13 = scalar_lea.hbm %s510_s0, 32 }
  0x16   :  { %p340_p8 = scmp.ne.s32.totalorder %s510_s0, %s339_s13  ;;  %p343_p9 = scmp.lt.u32.totalorder %s339_s13, %s510_s0 }
  0x18   :  { %p345_p10 = pnand %p343_p9, %p340_p8 }
  0x1a   :  { %348 = shalt.err (!%p345_p10)
}
  0x1b   :  { %s349_s1 = scalar_lea.vmem %s20_s8, 32  ;;  %p354_p12 = scmp.lt.s32.totalorder %s20_s8, %s20_s8 }
  0x1c   :  { %p350_p11 = scmp.ne.s32.totalorder %s20_s8, %s349_s1  ;;  %p355_p13 = scmp.lt.s32.totalorder %s349_s1, %s349_s1 }
  0x1e   :  { %p356_p0 = por %p355_p13, %p354_p12 }
  0x20   :  { %p357_p1 = pnand %p356_p0, %p350_p11 }
  0x22   :  { %360 = shalt.err (!%p357_p1)
}
  0x23   :  { %22 = dma.hbm_to_vmem [thread:$0]  %s510_s0, 32, %s20_s8, [#allocation3]  }
  0x24   :  { %s361_s22 = scalar_lea.hbm %s513_s3, 512 }
  0x25   :  { %p362_p2 = scmp.ne.s32.totalorder %s513_s3, %s361_s22  ;;  %p365_p3 = scmp.lt.u32.totalorder %s361_s22, %s513_s3 }
  0x27   :  { %p367_p4 = pnand %p365_p3, %p362_p2 }
  0x29   :  { %370 = shalt.err (!%p367_p4)
}
  0x2a   :  { %s371_s27 = scalar_lea.vmem %s43_s10, 512  ;;  %p376_p6 = scmp.lt.s32.totalorder %s43_s10, %s43_s10 }
  0x2b   :  { %p372_p5 = scmp.ne.s32.totalorder %s43_s10, %s371_s27  ;;  %p377_p7 = scmp.lt.s32.totalorder %s371_s27, %s371_s27 }
  0x2d   :  { %p378_p8 = por %p377_p7, %p376_p6 }
  0x2f   :  { %p379_p9 = pnand %p378_p8, %p372_p5 }
  0x31   :  { %382 = shalt.err (!%p379_p9)
}
  0x32   :  { %48 = dma.hbm_to_vmem [thread:$0]  %s513_s3, 512, %s43_s10, [#allocation6], %s412_s28, %s412_s28, %s413_s29  }
  0x33   :  { %405 = dma.done.wait [#allocation3], 32  }
  0x34   :  { %406 = vsyncadd [#allocation3], 4294967264 }
  0x35   :  { %407 = dma.done.wait [#allocation6], 1024  }
  0x36   :  { %408 = vsyncadd [#allocation6], 4294966272  ;;  %v416_v0 = vmov 0.0|0.0   ;;  %vm417_vm0 = vmmov 0   ;;  %v418_v1 = vmov 0.0   ;;  %v61_v2 = vld [vmem:[#allocation5] sm:$0xff] }
  0x37   :  { %292 = vmatprep.subr.bf16.mxu0 %v416_v0  ;;  %278 = vmatprep.mubr.msk.f32.mxu0 %vm417_vm0, %v418_v1  ;;  %v62_v3 = vld [vmem:[#allocation5 + $0x8] sm:$0xff]  ;;  %v63_v4 = vld [vmem:[#allocation5 + $0x10] sm:$0xff]  ;;  %v64_v6 = vld [vmem:[#allocation5 + $0x18] sm:$0xff]  ;;  %vm72_vm1 = vcmask 261120   ;;  %s419_s7 = smov [#allocation8]   ;;  %vm237_vm2 = vcmask 254976  }
  0x38   :  { %298 = vmatprep.subr.bf16.mxu1 %v416_v0  ;;  %289 = vmatprep.mubr.msk.f32.mxu1 %vm417_vm0, %v418_v1  ;;  %v293_v5 = vpack.c.bf16 %v62_v3, %v61_v2  ;;  %v147_v7 = vld [vmem:[#allocation7] sm:$0xff]  ;;  %v148_v8 = vld [vmem:[#allocation7 + $0x8] sm:$0xff]  ;;  %v296_v9 = vpack.c.bf16 %v64_v6, %v63_v4  ;;  %v60_v11 = vld [vmem:[#allocation2] sm:$0x3]  ;;  %s245_s8 = sshll.u32 %s419_s7, 4  ;;  %s246_s8 = int_to_ptr.vmem [resolvable:$true] %s245_s8 }
  0x39   :  { %v299_v10 = vpack.c.bf16 %v148_v8, %v147_v7  ;;  %v149_v12 = vld [vmem:[#allocation7 + $0x10] sm:$0xff]  ;;  %v150_v13 = vld [vmem:[#allocation7 + $0x18] sm:$0xff]  ;;  %p388_p11 = scmp.lt.s32.totalorder %s246_s8, %s246_s8 }
  0x3a   :  { %294 = vmatpush3.bf16.msra.mxu0 %v293_v5  ;;  %v302_v14 = vpack.c.bf16 %v150_v13, %v149_v12  ;;  %v255_v15 = vld [vmem:[%s512_s2] ss:$0 sm:$0xff]  ;;  %s383_s2 = scalar_lea.vmem %s246_s8, 32 }
  0x3b   :  { %295 = vmatprep.subr.bf16.mxu0 %v416_v0  ;;  %300 = vmatpush3.bf16.msra.mxu1 %v299_v10  ;;  %v257_v20 = vld [vmem:[%s514_s4] ss:$0 sm:$0xff]  ;;  %p384_p10 = scmp.ne.s32.totalorder %s246_s8, %s383_s2  ;;  %p389_p12 = scmp.lt.s32.totalorder %s383_s2, %s383_s2 }
  0x3c   :  { %301 = vmatprep.subr.bf16.mxu1 %v416_v0 }
  0x3d   :  { %p390_p13 = por %p389_p12, %p388_p11 }
  0x3e   :  { %297 = vmatpush3.bf16.msra.mxu0 %v296_v9 }
  0x3f   :  { %303 = vmatpush3.bf16.msra.mxu1 %v302_v14  ;;  %p391_p0 = pnand %p390_p13, %p384_p10 }
  0x41   :  { %279 = vmatmul.mubr.msk.f32.vlgmr.msra.gmra.mrb[0].mxu0 %vm72_vm1, %v60_v11 }
 0x114   :  { %v142_v16 = vpop.f32.mrb[0].mxu0 }
 0x115   :  { %v143_v17 = vadd.f32 %v255_v15, %v142_v16  ;;  %v280_v18 = vpop.f32.mrb[1].mxu0 }
 0x117   :  { %v146_v19 = vmax.f32 %v143_v17, 0.0 }
 0x119   :  { %290 = vmatmul.mubr.msk.f32.vlgmr.msra.gmra.mrb[0].mxu1 %vm72_vm1, %v146_v19 }
 0x1ec   :  { %v227_v21 = vpop.f32.mrb[0].mxu1 }
 0x1ed   :  { %v228_v22 = vadd.f32 %v257_v20, %v227_v21  ;;  %v291_v23 = vpop.f32.mrb[1].mxu1 }
 0x1ef   :  { %v259_v24 = vmul.f32 -1.442695, %v228_v22 }
 0x1f1   :  { %313 = vpow2.f32 %v259_v24 }
 0x1fb   :  { %v314_v25 = vpop.eup %313 }
 0x1fc   :  { %v234_v26 = vadd.f32 1.0, %v314_v25 }
 0x1fe   :  { %315 = vrcp.f32 %v234_v26 }
 0x208   :  { %v316_v27 = vpop.eup %315 }
 0x209   :  { %238 = vst.msk [vmem:[#allocation8] sm:$0x3] %vm237_vm2, %v316_v27 }
 0x20a   :  { %394 = shalt.err (!%p391_p0)
}
 0x20b   :  { %s395_s10 = scalar_lea.hbm %s515_s5, 32 }
 0x20c   :  { %p396_p1 = scmp.ne.s32.totalorder %s515_s5, %s395_s10  ;;  %p399_p2 = scmp.lt.u32.totalorder %s395_s10, %s515_s5 }
 0x20e   :  { %p401_p3 = pnand %p399_p2, %p396_p1 }
 0x210   :  { %404 = shalt.err (!%p401_p3)
}
 0x211   :  { %248 = dma.vmem_to_hbm [thread:$0]  %s246_s8, 32, %s515_s5, [#allocation4]  }
 0x212   :  { %409 = dma.done.wait [#allocation4], 32  }
 0x213   :  { %410 = vsyncadd [#allocation4], 4294967264 }
 0x214   :  { %252 = vsyncpa [#allocation3], 1 }
 0x215   :  { %253 = vsyncpa [#allocation6], 1 }
 0x216   :  { %254 = vsyncpa [#allocation4], 1 }

</bundles_post_ra>
